<compile_context>
chip_gen: v7x
topology: tpu7x:2x2x1
jax: 0.10.0
libtpu: 0.0.40
codegen_flags: <defaults>
</compile_context>

<pallas_src>
import functools

import jax
import jax.numpy as jnp
from jax import lax
from jax.experimental import pallas as pl
from jax.experimental.pallas import tpu as pltpu

_IN, _H1, _H2, _OUT = 7, 5, 3, 6
_LANES = 128
_CHUNK_SUBLANES = 8        # 8 sublanes * 128 lanes = 1024 rows per inner step


def _round_up(n, m):
    return (n + m - 1) // m * m


def _cdiv(a, b):
    return -(-a // b)


def _make_mlp_kernel(tbs):
    """Kernel over one (7, tbs, 128) input block -> (6, tbs, 128) output block."""
    ch = _CHUNK_SUBLANES if tbs >= _CHUNK_SUBLANES else tbs
    assert tbs % ch == 0
    n_chunks = tbs // ch

    def kernel(x_ref, w1_ref, b1_ref, w2_ref, b2_ref, w3_ref, b3_ref, o_ref):
        # Hoist every SMEM scalar read above the chunk loop (single sld each).
        w1 = [[w1_ref[o, i] for i in range(_IN)] for o in range(_H1)]
        b1 = [b1_ref[o] for o in range(_H1)]
        w2 = [[w2_ref[o, i] for i in range(_H1)] for o in range(_H2)]
        b2 = [b2_ref[o] for o in range(_H2)]
        # w3/b3 arrive pre-scaled by 0.5: sigmoid(z) = 0.5*tanh(z/2) + 0.5.
        w3 = [[w3_ref[o, i] for i in range(_H2)] for o in range(_OUT)]
        b3 = [b3_ref[o] for o in range(_OUT)]

        def compute_chunk(s):
            x = [x_ref[i, pl.ds(s, ch), :] for i in range(_IN)]   # 7 x (ch, 128)

            # fc1 + ReLU (bias folded into accumulator init)
            h1 = []
            for o in range(_H1):
                acc = x[0] * w1[o][0] + b1[o]
                for i in range(1, _IN):
                    acc = acc + x[i] * w1[o][i]
                h1.append(jnp.maximum(acc, 0.0))

            # fc2 + ReLU
            h2 = []
            for o in range(_H2):
                acc = h1[0] * w2[o][0] + b2[o]
                for i in range(1, _H1):
                    acc = acc + h1[i] * w2[o][i]
                h2.append(jnp.maximum(acc, 0.0))

            # fc3 + sigmoid (EUP tanh; 0.5 scale already folded into w3/b3)
            for o in range(_OUT):
                acc = h2[0] * w3[o][0] + b3[o]
                for i in range(1, _H2):
                    acc = acc + h2[i] * w3[o][i]
                o_ref[o, pl.ds(s, ch), :] = 0.5 * jnp.tanh(acc) + 0.5

        if n_chunks == 1:
            compute_chunk(0)
        else:
            def body(c, carry):
                compute_chunk(pl.multiple_of(c * ch, ch))
                return carry
            lax.fori_loop(0, n_chunks, body, 0)

    return kernel


def _choose_tiling(batch, block_b):
    """Return (padded_batch, rows_per_grid_step, grid_steps)."""
    assert block_b % 1024 == 0 and block_b >= 1024, "block_b must be a multiple of 1024"
    if batch <= 1024:
        b_pad = _round_up(batch, _LANES)        # single block == full array
        return b_pad, b_pad, 1
    units = _cdiv(batch, 1024)                  # 1024-row granules
    max_units = block_b // 1024
    steps = max(2, _cdiv(units, max_units))     # >=2 steps so megacore can split
    units_per_step = _cdiv(units, steps)
    steps = _cdiv(units, units_per_step)
    tb = units_per_step * 1024
    return steps * tb, tb, steps                # padding waste < one block


@functools.partial(jax.jit, static_argnames=("block_b",))
def net_forward_feature_major(xt, params, block_b=32768):
    """Fast path. xt: (7, B) float -> (6, B) float32.

    No wrapper-side transposes: total HBM traffic is ~52 B/row (28 in + 24 out),
    plus an optional tail-pad copy when B is not a multiple of the tile.
    """
    w1, b1, w2, b2, w3, b3 = params
    assert xt.shape[0] == _IN
    batch = xt.shape[1]
    b_pad, tb, steps = _choose_tiling(batch, block_b)
    tbs = tb // _LANES

    x = xt.astype(jnp.float32)
    if b_pad != batch:
        x = jnp.pad(x, ((0, 0), (0, b_pad - batch)))
    x = x.reshape(_IN, b_pad // _LANES, _LANES)     # free reshape: lane-dense batch

    # Fold the 0.5 of sigmoid(z) = 0.5*tanh(0.5*z) + 0.5 into fc3's params.
    w3h = (0.5 * w3).astype(jnp.float32)
    b3h = (0.5 * b3).astype(jnp.float32)

    smem = pl.BlockSpec(memory_space=pltpu.MemorySpace.SMEM)
    cost = pl.CostEstimate(
        flops=2 * (_IN * _H1 + _H1 * _H2 + _H2 * _OUT) * b_pad,
        transcendentals=_OUT * b_pad,
        bytes_accessed=(_IN + _OUT) * 4 * b_pad)

    out = pl.pallas_call(
        _make_mlp_kernel(tbs),
        out_shape=jax.ShapeDtypeStruct((_OUT, b_pad // _LANES, _LANES), jnp.float32),
        grid=(steps,),
        in_specs=[
            pl.BlockSpec((_IN, tbs, _LANES), lambda i: (0, i, 0)),
            smem, smem, smem, smem, smem, smem,
        ],
        out_specs=pl.BlockSpec((_OUT, tbs, _LANES), lambda i: (0, i, 0)),
        compiler_params=pltpu.CompilerParams(
            dimension_semantics=("parallel",)),
        cost_estimate=cost,
    )(x, w1.astype(jnp.float32), b1.astype(jnp.float32),
      w2.astype(jnp.float32), b2.astype(jnp.float32), w3h, b3h)

    out = out.reshape(_OUT, b_pad)
    return out[:, :batch] if b_pad != batch else out


@functools.partial(jax.jit, static_argnames=("block_b",))
def net_forward(x, params, block_b=32768):
    """PyTorch `Net` contract: x (B, 7) -> (B, 6).

    Thin transpose shim around the feature-major fast path; callers that can
    supply feature-major activations should use net_forward_feature_major to
    avoid the two extra HBM passes on this memory-bound op.
    """
    out_t = net_forward_feature_major(jnp.transpose(x), params, block_b=block_b)
    return jnp.transpose(out_t)


def init_params(key):
    """Deterministic init mirroring nn.Linear: W is (out, in), b is (out,)."""
    ks = jax.random.split(key, 6)

    def linear(kw, kb, fan_in, fan_out):
        bound = 1.0 / float(fan_in) ** 0.5
        w = jax.random.uniform(kw, (fan_out, fan_in), jnp.float32, -bound, bound)
        b = jax.random.uniform(kb, (fan_out,), jnp.float32, -bound, bound)
        return w, b

    w1, b1 = linear(ks[0], ks[1], _IN, _H1)
    w2, b2 = linear(ks[2], ks[3], _H1, _H2)
    w3, b3 = linear(ks[4], ks[5], _H2, _OUT)
    return (w1, b1, w2, b2, w3, b3)


if __name__ == "__main__":
    key = jax.random.PRNGKey(0)
    k_x, k_x2, k_p = jax.random.split(key, 3)
    params = init_params(k_p)
    w1, b1, w2, b2, w3, b3 = params

    def ref_forward(xin):   # pure-JAX reference (torch semantics: y = x @ W.T + b)
        h = jax.nn.relu(xin @ w1.T + b1)
        h = jax.nn.relu(h @ w2.T + b2)
        return jax.nn.sigmoid(h @ w3.T + b3)

    # Small module-shaped test: (batch, 7) -> (batch, 6).
    batch = 8
    x = jax.random.normal(k_x, (batch, _IN), dtype=jnp.float32)
    out = jax.block_until_ready(net_forward(x, params))
    assert out.shape == (batch, _OUT)
    assert jnp.allclose(out, ref_forward(x), atol=1e-5, rtol=1e-5)

    # Exercise the multi-step grid + chunked inner loop + tail-padding path.
    batch2 = 4100
    x2 = jax.random.normal(k_x2, (batch2, _IN), dtype=jnp.float32)
    out2 = jax.block_until_ready(net_forward(x2, params))
    assert out2.shape == (batch2, _OUT)
    assert jnp.allclose(out2, ref_forward(x2), atol=1e-5, rtol=1e-5)

    # Feature-major fast path (no wrapper transposes at all).
    out3 = jax.block_until_ready(net_forward_feature_major(x2.T, params))
    assert out3.shape == (_OUT, batch2)
    assert jnp.allclose(out3.T, ref_forward(x2), atol=1e-5, rtol=1e-5)

    print("KERNEL_OK")
</pallas_src>

<mosaic_0001>
module attributes {stable_mosaic.version = 11 : i64} {
  func.func @kernel(%arg0: i32, %arg1: memref<7x1x128xf32, #tpu.memory_space<vmem>>, %arg2: memref<5x7xf32, #tpu.memory_space<smem>>, %arg3: memref<5xf32, #tpu.memory_space<smem>>, %arg4: memref<3x5xf32, #tpu.memory_space<smem>>, %arg5: memref<3xf32, #tpu.memory_space<smem>>, %arg6: memref<6x3xf32, #tpu.memory_space<smem>>, %arg7: memref<6xf32, #tpu.memory_space<smem>>, %arg8: memref<6x1x128xf32, #tpu.memory_space<vmem>>) attributes {dimension_semantics = [#tpu.dimension_semantics<parallel>], iteration_bounds = array<i64: 1>, scalar_prefetch = 0 : i64, scratch_operands = 0 : i64, tpu.core_type = #tpu.core_type<tc>, window_params = [{transform_indices = @transform_0, window_bounds = array<i64: 7, 1, 128>}, {transform_indices = @transform_1, window_bounds = array<i64: 5, 7>}, {transform_indices = @transform_2, window_bounds = array<i64: 5>}, {transform_indices = @transform_3, window_bounds = array<i64: 3, 5>}, {transform_indices = @transform_4, window_bounds = array<i64: 3>}, {transform_indices = @transform_5, window_bounds = array<i64: 6, 3>}, {transform_indices = @transform_6, window_bounds = array<i64: 6>}, {transform_indices = @transform_7, window_bounds = array<i64: 6, 1, 128>}]} {
    %c0 = arith.constant 0 : index
    %c0_0 = arith.constant 0 : index
    %0 = memref.load %arg2[%c0, %c0_0] : memref<5x7xf32, #tpu.memory_space<smem>>
    %c0_1 = arith.constant 0 : index
    %c1 = arith.constant 1 : index
    %1 = memref.load %arg2[%c0_1, %c1] : memref<5x7xf32, #tpu.memory_space<smem>>
    %c0_2 = arith.constant 0 : index
    %c2 = arith.constant 2 : index
    %2 = memref.load %arg2[%c0_2, %c2] : memref<5x7xf32, #tpu.memory_space<smem>>
    %c0_3 = arith.constant 0 : index
    %c3 = arith.constant 3 : index
    %3 = memref.load %arg2[%c0_3, %c3] : memref<5x7xf32, #tpu.memory_space<smem>>
    %c0_4 = arith.constant 0 : index
    %c4 = arith.constant 4 : index
    %4 = memref.load %arg2[%c0_4, %c4] : memref<5x7xf32, #tpu.memory_space<smem>>
    %c0_5 = arith.constant 0 : index
    %c5 = arith.constant 5 : index
    %5 = memref.load %arg2[%c0_5, %c5] : memref<5x7xf32, #tpu.memory_space<smem>>
    %c0_6 = arith.constant 0 : index
    %c6 = arith.constant 6 : index
    %6 = memref.load %arg2[%c0_6, %c6] : memref<5x7xf32, #tpu.memory_space<smem>>
    %c1_7 = arith.constant 1 : index
    %c0_8 = arith.constant 0 : index
    %7 = memref.load %arg2[%c1_7, %c0_8] : memref<5x7xf32, #tpu.memory_space<smem>>
    %c1_9 = arith.constant 1 : index
    %c1_10 = arith.constant 1 : index
    %8 = memref.load %arg2[%c1_9, %c1_10] : memref<5x7xf32, #tpu.memory_space<smem>>
    %c1_11 = arith.constant 1 : index
    %c2_12 = arith.constant 2 : index
    %9 = memref.load %arg2[%c1_11, %c2_12] : memref<5x7xf32, #tpu.memory_space<smem>>
    %c1_13 = arith.constant 1 : index
    %c3_14 = arith.constant 3 : index
    %10 = memref.load %arg2[%c1_13, %c3_14] : memref<5x7xf32, #tpu.memory_space<smem>>
    %c1_15 = arith.constant 1 : index
    %c4_16 = arith.constant 4 : index
    %11 = memref.load %arg2[%c1_15, %c4_16] : memref<5x7xf32, #tpu.memory_space<smem>>
    %c1_17 = arith.constant 1 : index
    %c5_18 = arith.constant 5 : index
    %12 = memref.load %arg2[%c1_17, %c5_18] : memref<5x7xf32, #tpu.memory_space<smem>>
    %c1_19 = arith.constant 1 : index
    %c6_20 = arith.constant 6 : index
    %13 = memref.load %arg2[%c1_19, %c6_20] : memref<5x7xf32, #tpu.memory_space<smem>>
    %c2_21 = arith.constant 2 : index
    %c0_22 = arith.constant 0 : index
    %14 = memref.load %arg2[%c2_21, %c0_22] : memref<5x7xf32, #tpu.memory_space<smem>>
    %c2_23 = arith.constant 2 : index
    %c1_24 = arith.constant 1 : index
    %15 = memref.load %arg2[%c2_23, %c1_24] : memref<5x7xf32, #tpu.memory_space<smem>>
    %c2_25 = arith.constant 2 : index
    %c2_26 = arith.constant 2 : index
    %16 = memref.load %arg2[%c2_25, %c2_26] : memref<5x7xf32, #tpu.memory_space<smem>>
    %c2_27 = arith.constant 2 : index
    %c3_28 = arith.constant 3 : index
    %17 = memref.load %arg2[%c2_27, %c3_28] : memref<5x7xf32, #tpu.memory_space<smem>>
    %c2_29 = arith.constant 2 : index
    %c4_30 = arith.constant 4 : index
    %18 = memref.load %arg2[%c2_29, %c4_30] : memref<5x7xf32, #tpu.memory_space<smem>>
    %c2_31 = arith.constant 2 : index
    %c5_32 = arith.constant 5 : index
    %19 = memref.load %arg2[%c2_31, %c5_32] : memref<5x7xf32, #tpu.memory_space<smem>>
    %c2_33 = arith.constant 2 : index
    %c6_34 = arith.constant 6 : index
    %20 = memref.load %arg2[%c2_33, %c6_34] : memref<5x7xf32, #tpu.memory_space<smem>>
    %c3_35 = arith.constant 3 : index
    %c0_36 = arith.constant 0 : index
    %21 = memref.load %arg2[%c3_35, %c0_36] : memref<5x7xf32, #tpu.memory_space<smem>>
    %c3_37 = arith.constant 3 : index
    %c1_38 = arith.constant 1 : index
    %22 = memref.load %arg2[%c3_37, %c1_38] : memref<5x7xf32, #tpu.memory_space<smem>>
    %c3_39 = arith.constant 3 : index
    %c2_40 = arith.constant 2 : index
    %23 = memref.load %arg2[%c3_39, %c2_40] : memref<5x7xf32, #tpu.memory_space<smem>>
    %c3_41 = arith.constant 3 : index
    %c3_42 = arith.constant 3 : index
    %24 = memref.load %arg2[%c3_41, %c3_42] : memref<5x7xf32, #tpu.memory_space<smem>>
    %c3_43 = arith.constant 3 : index
    %c4_44 = arith.constant 4 : index
    %25 = memref.load %arg2[%c3_43, %c4_44] : memref<5x7xf32, #tpu.memory_space<smem>>
    %c3_45 = arith.constant 3 : index
    %c5_46 = arith.constant 5 : index
    %26 = memref.load %arg2[%c3_45, %c5_46] : memref<5x7xf32, #tpu.memory_space<smem>>
    %c3_47 = arith.constant 3 : index
    %c6_48 = arith.constant 6 : index
    %27 = memref.load %arg2[%c3_47, %c6_48] : memref<5x7xf32, #tpu.memory_space<smem>>
    %c4_49 = arith.constant 4 : index
    %c0_50 = arith.constant 0 : index
    %28 = memref.load %arg2[%c4_49, %c0_50] : memref<5x7xf32, #tpu.memory_space<smem>>
    %c4_51 = arith.constant 4 : index
    %c1_52 = arith.constant 1 : index
    %29 = memref.load %arg2[%c4_51, %c1_52] : memref<5x7xf32, #tpu.memory_space<smem>>
    %c4_53 = arith.constant 4 : index
    %c2_54 = arith.constant 2 : index
    %30 = memref.load %arg2[%c4_53, %c2_54] : memref<5x7xf32, #tpu.memory_space<smem>>
    %c4_55 = arith.constant 4 : index
    %c3_56 = arith.constant 3 : index
    %31 = memref.load %arg2[%c4_55, %c3_56] : memref<5x7xf32, #tpu.memory_space<smem>>
    %c4_57 = arith.constant 4 : index
    %c4_58 = arith.constant 4 : index
    %32 = memref.load %arg2[%c4_57, %c4_58] : memref<5x7xf32, #tpu.memory_space<smem>>
    %c4_59 = arith.constant 4 : index
    %c5_60 = arith.constant 5 : index
    %33 = memref.load %arg2[%c4_59, %c5_60] : memref<5x7xf32, #tpu.memory_space<smem>>
    %c4_61 = arith.constant 4 : index
    %c6_62 = arith.constant 6 : index
    %34 = memref.load %arg2[%c4_61, %c6_62] : memref<5x7xf32, #tpu.memory_space<smem>>
    %c0_63 = arith.constant 0 : index
    %35 = memref.load %arg3[%c0_63] : memref<5xf32, #tpu.memory_space<smem>>
    %c1_64 = arith.constant 1 : index
    %36 = memref.load %arg3[%c1_64] : memref<5xf32, #tpu.memory_space<smem>>
    %c2_65 = arith.constant 2 : index
    %37 = memref.load %arg3[%c2_65] : memref<5xf32, #tpu.memory_space<smem>>
    %c3_66 = arith.constant 3 : index
    %38 = memref.load %arg3[%c3_66] : memref<5xf32, #tpu.memory_space<smem>>
    %c4_67 = arith.constant 4 : index
    %39 = memref.load %arg3[%c4_67] : memref<5xf32, #tpu.memory_space<smem>>
    %c0_68 = arith.constant 0 : index
    %c0_69 = arith.constant 0 : index
    %40 = memref.load %arg4[%c0_68, %c0_69] : memref<3x5xf32, #tpu.memory_space<smem>>
    %c0_70 = arith.constant 0 : index
    %c1_71 = arith.constant 1 : index
    %41 = memref.load %arg4[%c0_70, %c1_71] : memref<3x5xf32, #tpu.memory_space<smem>>
    %c0_72 = arith.constant 0 : index
    %c2_73 = arith.constant 2 : index
    %42 = memref.load %arg4[%c0_72, %c2_73] : memref<3x5xf32, #tpu.memory_space<smem>>
    %c0_74 = arith.constant 0 : index
    %c3_75 = arith.constant 3 : index
    %43 = memref.load %arg4[%c0_74, %c3_75] : memref<3x5xf32, #tpu.memory_space<smem>>
    %c0_76 = arith.constant 0 : index
    %c4_77 = arith.constant 4 : index
    %44 = memref.load %arg4[%c0_76, %c4_77] : memref<3x5xf32, #tpu.memory_space<smem>>
    %c1_78 = arith.constant 1 : index
    %c0_79 = arith.constant 0 : index
    %45 = memref.load %arg4[%c1_78, %c0_79] : memref<3x5xf32, #tpu.memory_space<smem>>
    %c1_80 = arith.constant 1 : index
    %c1_81 = arith.constant 1 : index
    %46 = memref.load %arg4[%c1_80, %c1_81] : memref<3x5xf32, #tpu.memory_space<smem>>
    %c1_82 = arith.constant 1 : index
    %c2_83 = arith.constant 2 : index
    %47 = memref.load %arg4[%c1_82, %c2_83] : memref<3x5xf32, #tpu.memory_space<smem>>
    %c1_84 = arith.constant 1 : index
    %c3_85 = arith.constant 3 : index
    %48 = memref.load %arg4[%c1_84, %c3_85] : memref<3x5xf32, #tpu.memory_space<smem>>
    %c1_86 = arith.constant 1 : index
    %c4_87 = arith.constant 4 : index
    %49 = memref.load %arg4[%c1_86, %c4_87] : memref<3x5xf32, #tpu.memory_space<smem>>
    %c2_88 = arith.constant 2 : index
    %c0_89 = arith.constant 0 : index
    %50 = memref.load %arg4[%c2_88, %c0_89] : memref<3x5xf32, #tpu.memory_space<smem>>
    %c2_90 = arith.constant 2 : index
    %c1_91 = arith.constant 1 : index
    %51 = memref.load %arg4[%c2_90, %c1_91] : memref<3x5xf32, #tpu.memory_space<smem>>
    %c2_92 = arith.constant 2 : index
    %c2_93 = arith.constant 2 : index
    %52 = memref.load %arg4[%c2_92, %c2_93] : memref<3x5xf32, #tpu.memory_space<smem>>
    %c2_94 = arith.constant 2 : index
    %c3_95 = arith.constant 3 : index
    %53 = memref.load %arg4[%c2_94, %c3_95] : memref<3x5xf32, #tpu.memory_space<smem>>
    %c2_96 = arith.constant 2 : index
    %c4_97 = arith.constant 4 : index
    %54 = memref.load %arg4[%c2_96, %c4_97] : memref<3x5xf32, #tpu.memory_space<smem>>
    %c0_98 = arith.constant 0 : index
    %55 = memref.load %arg5[%c0_98] : memref<3xf32, #tpu.memory_space<smem>>
    %c1_99 = arith.constant 1 : index
    %56 = memref.load %arg5[%c1_99] : memref<3xf32, #tpu.memory_space<smem>>
    %c2_100 = arith.constant 2 : index
    %57 = memref.load %arg5[%c2_100] : memref<3xf32, #tpu.memory_space<smem>>
    %c0_101 = arith.constant 0 : index
    %c0_102 = arith.constant 0 : index
    %58 = memref.load %arg6[%c0_101, %c0_102] : memref<6x3xf32, #tpu.memory_space<smem>>
    %c0_103 = arith.constant 0 : index
    %c1_104 = arith.constant 1 : index
    %59 = memref.load %arg6[%c0_103, %c1_104] : memref<6x3xf32, #tpu.memory_space<smem>>
    %c0_105 = arith.constant 0 : index
    %c2_106 = arith.constant 2 : index
    %60 = memref.load %arg6[%c0_105, %c2_106] : memref<6x3xf32, #tpu.memory_space<smem>>
    %c1_107 = arith.constant 1 : index
    %c0_108 = arith.constant 0 : index
    %61 = memref.load %arg6[%c1_107, %c0_108] : memref<6x3xf32, #tpu.memory_space<smem>>
    %c1_109 = arith.constant 1 : index
    %c1_110 = arith.constant 1 : index
    %62 = memref.load %arg6[%c1_109, %c1_110] : memref<6x3xf32, #tpu.memory_space<smem>>
    %c1_111 = arith.constant 1 : index
    %c2_112 = arith.constant 2 : index
    %63 = memref.load %arg6[%c1_111, %c2_112] : memref<6x3xf32, #tpu.memory_space<smem>>
    %c2_113 = arith.constant 2 : index
    %c0_114 = arith.constant 0 : index
    %64 = memref.load %arg6[%c2_113, %c0_114] : memref<6x3xf32, #tpu.memory_space<smem>>
    %c2_115 = arith.constant 2 : index
    %c1_116 = arith.constant 1 : index
    %65 = memref.load %arg6[%c2_115, %c1_116] : memref<6x3xf32, #tpu.memory_space<smem>>
    %c2_117 = arith.constant 2 : index
    %c2_118 = arith.constant 2 : index
    %66 = memref.load %arg6[%c2_117, %c2_118] : memref<6x3xf32, #tpu.memory_space<smem>>
    %c3_119 = arith.constant 3 : index
    %c0_120 = arith.constant 0 : index
    %67 = memref.load %arg6[%c3_119, %c0_120] : memref<6x3xf32, #tpu.memory_space<smem>>
    %c3_121 = arith.constant 3 : index
    %c1_122 = arith.constant 1 : index
    %68 = memref.load %arg6[%c3_121, %c1_122] : memref<6x3xf32, #tpu.memory_space<smem>>
    %c3_123 = arith.constant 3 : index
    %c2_124 = arith.constant 2 : index
    %69 = memref.load %arg6[%c3_123, %c2_124] : memref<6x3xf32, #tpu.memory_space<smem>>
    %c4_125 = arith.constant 4 : index
    %c0_126 = arith.constant 0 : index
    %70 = memref.load %arg6[%c4_125, %c0_126] : memref<6x3xf32, #tpu.memory_space<smem>>
    %c4_127 = arith.constant 4 : index
    %c1_128 = arith.constant 1 : index
    %71 = memref.load %arg6[%c4_127, %c1_128] : memref<6x3xf32, #tpu.memory_space<smem>>
    %c4_129 = arith.constant 4 : index
    %c2_130 = arith.constant 2 : index
    %72 = memref.load %arg6[%c4_129, %c2_130] : memref<6x3xf32, #tpu.memory_space<smem>>
    %c5_131 = arith.constant 5 : index
    %c0_132 = arith.constant 0 : index
    %73 = memref.load %arg6[%c5_131, %c0_132] : memref<6x3xf32, #tpu.memory_space<smem>>
    %c5_133 = arith.constant 5 : index
    %c1_134 = arith.constant 1 : index
    %74 = memref.load %arg6[%c5_133, %c1_134] : memref<6x3xf32, #tpu.memory_space<smem>>
    %c5_135 = arith.constant 5 : index
    %c2_136 = arith.constant 2 : index
    %75 = memref.load %arg6[%c5_135, %c2_136] : memref<6x3xf32, #tpu.memory_space<smem>>
    %c0_137 = arith.constant 0 : index
    %76 = memref.load %arg7[%c0_137] : memref<6xf32, #tpu.memory_space<smem>>
    %c1_138 = arith.constant 1 : index
    %77 = memref.load %arg7[%c1_138] : memref<6xf32, #tpu.memory_space<smem>>
    %c2_139 = arith.constant 2 : index
    %78 = memref.load %arg7[%c2_139] : memref<6xf32, #tpu.memory_space<smem>>
    %c3_140 = arith.constant 3 : index
    %79 = memref.load %arg7[%c3_140] : memref<6xf32, #tpu.memory_space<smem>>
    %c4_141 = arith.constant 4 : index
    %80 = memref.load %arg7[%c4_141] : memref<6xf32, #tpu.memory_space<smem>>
    %c5_142 = arith.constant 5 : index
    %81 = memref.load %arg7[%c5_142] : memref<6xf32, #tpu.memory_space<smem>>
    %c0_143 = arith.constant 0 : index
    %c0_144 = arith.constant 0 : index
    %c0_145 = arith.constant 0 : index
    %82 = vector.load %arg1[%c0_143, %c0_144, %c0_145] : memref<7x1x128xf32, #tpu.memory_space<vmem>>, vector<1x1x128xf32>
    %83 = vector.shape_cast %82 : vector<1x1x128xf32> to vector<1x128xf32>
    %c1_146 = arith.constant 1 : index
    %c0_147 = arith.constant 0 : index
    %c0_148 = arith.constant 0 : index
    %84 = vector.load %arg1[%c1_146, %c0_147, %c0_148] : memref<7x1x128xf32, #tpu.memory_space<vmem>>, vector<1x1x128xf32>
    %85 = vector.shape_cast %84 : vector<1x1x128xf32> to vector<1x128xf32>
    %c2_149 = arith.constant 2 : index
    %c0_150 = arith.constant 0 : index
    %c0_151 = arith.constant 0 : index
    %86 = vector.load %arg1[%c2_149, %c0_150, %c0_151] : memref<7x1x128xf32, #tpu.memory_space<vmem>>, vector<1x1x128xf32>
    %87 = vector.shape_cast %86 : vector<1x1x128xf32> to vector<1x128xf32>
    %c3_152 = arith.constant 3 : index
    %c0_153 = arith.constant 0 : index
    %c0_154 = arith.constant 0 : index
    %88 = vector.load %arg1[%c3_152, %c0_153, %c0_154] : memref<7x1x128xf32, #tpu.memory_space<vmem>>, vector<1x1x128xf32>
    %89 = vector.shape_cast %88 : vector<1x1x128xf32> to vector<1x128xf32>
    %c4_155 = arith.constant 4 : index
    %c0_156 = arith.constant 0 : index
    %c0_157 = arith.constant 0 : index
    %90 = vector.load %arg1[%c4_155, %c0_156, %c0_157] : memref<7x1x128xf32, #tpu.memory_space<vmem>>, vector<1x1x128xf32>
    %91 = vector.shape_cast %90 : vector<1x1x128xf32> to vector<1x128xf32>
    %c5_158 = arith.constant 5 : index
    %c0_159 = arith.constant 0 : index
    %c0_160 = arith.constant 0 : index
    %92 = vector.load %arg1[%c5_158, %c0_159, %c0_160] : memref<7x1x128xf32, #tpu.memory_space<vmem>>, vector<1x1x128xf32>
    %93 = vector.shape_cast %92 : vector<1x1x128xf32> to vector<1x128xf32>
    %c6_161 = arith.constant 6 : index
    %c0_162 = arith.constant 0 : index
    %c0_163 = arith.constant 0 : index
    %94 = vector.load %arg1[%c6_161, %c0_162, %c0_163] : memref<7x1x128xf32, #tpu.memory_space<vmem>>, vector<1x1x128xf32>
    %95 = vector.shape_cast %94 : vector<1x1x128xf32> to vector<1x128xf32>
    %96 = vector.broadcast %0 : f32 to vector<1x128xf32>
    %97 = arith.mulf %83, %96 : vector<1x128xf32>
    %98 = vector.broadcast %35 : f32 to vector<1x128xf32>
    %99 = arith.addf %97, %98 : vector<1x128xf32>
    %100 = vector.broadcast %1 : f32 to vector<1x128xf32>
    %101 = arith.mulf %85, %100 : vector<1x128xf32>
    %102 = arith.addf %99, %101 : vector<1x128xf32>
    %103 = vector.broadcast %2 : f32 to vector<1x128xf32>
    %104 = arith.mulf %87, %103 : vector<1x128xf32>
    %105 = arith.addf %102, %104 : vector<1x128xf32>
    %106 = vector.broadcast %3 : f32 to vector<1x128xf32>
    %107 = arith.mulf %89, %106 : vector<1x128xf32>
    %108 = arith.addf %105, %107 : vector<1x128xf32>
    %109 = vector.broadcast %4 : f32 to vector<1x128xf32>
    %110 = arith.mulf %91, %109 : vector<1x128xf32>
    %111 = arith.addf %108, %110 : vector<1x128xf32>
    %112 = vector.broadcast %5 : f32 to vector<1x128xf32>
    %113 = arith.mulf %93, %112 : vector<1x128xf32>
    %114 = arith.addf %111, %113 : vector<1x128xf32>
    %115 = vector.broadcast %6 : f32 to vector<1x128xf32>
    %116 = arith.mulf %95, %115 : vector<1x128xf32>
    %117 = arith.addf %114, %116 : vector<1x128xf32>
    %cst = arith.constant 0.000000e+00 : f32
    %118 = vector.broadcast %cst : f32 to vector<1x128xf32>
    %119 = arith.maximumf %117, %118 : vector<1x128xf32>
    %120 = vector.broadcast %7 : f32 to vector<1x128xf32>
    %121 = arith.mulf %83, %120 : vector<1x128xf32>
    %122 = vector.broadcast %36 : f32 to vector<1x128xf32>
    %123 = arith.addf %121, %122 : vector<1x128xf32>
    %124 = vector.broadcast %8 : f32 to vector<1x128xf32>
    %125 = arith.mulf %85, %124 : vector<1x128xf32>
    %126 = arith.addf %123, %125 : vector<1x128xf32>
    %127 = vector.broadcast %9 : f32 to vector<1x128xf32>
    %128 = arith.mulf %87, %127 : vector<1x128xf32>
    %129 = arith.addf %126, %128 : vector<1x128xf32>
    %130 = vector.broadcast %10 : f32 to vector<1x128xf32>
    %131 = arith.mulf %89, %130 : vector<1x128xf32>
    %132 = arith.addf %129, %131 : vector<1x128xf32>
    %133 = vector.broadcast %11 : f32 to vector<1x128xf32>
    %134 = arith.mulf %91, %133 : vector<1x128xf32>
    %135 = arith.addf %132, %134 : vector<1x128xf32>
    %136 = vector.broadcast %12 : f32 to vector<1x128xf32>
    %137 = arith.mulf %93, %136 : vector<1x128xf32>
    %138 = arith.addf %135, %137 : vector<1x128xf32>
    %139 = vector.broadcast %13 : f32 to vector<1x128xf32>
    %140 = arith.mulf %95, %139 : vector<1x128xf32>
    %141 = arith.addf %138, %140 : vector<1x128xf32>
    %cst_164 = arith.constant 0.000000e+00 : f32
    %142 = vector.broadcast %cst_164 : f32 to vector<1x128xf32>
    %143 = arith.maximumf %141, %142 : vector<1x128xf32>
    %144 = vector.broadcast %14 : f32 to vector<1x128xf32>
    %145 = arith.mulf %83, %144 : vector<1x128xf32>
    %146 = vector.broadcast %37 : f32 to vector<1x128xf32>
    %147 = arith.addf %145, %146 : vector<1x128xf32>
    %148 = vector.broadcast %15 : f32 to vector<1x128xf32>
    %149 = arith.mulf %85, %148 : vector<1x128xf32>
    %150 = arith.addf %147, %149 : vector<1x128xf32>
    %151 = vector.broadcast %16 : f32 to vector<1x128xf32>
    %152 = arith.mulf %87, %151 : vector<1x128xf32>
    %153 = arith.addf %150, %152 : vector<1x128xf32>
    %154 = vector.broadcast %17 : f32 to vector<1x128xf32>
    %155 = arith.mulf %89, %154 : vector<1x128xf32>
    %156 = arith.addf %153, %155 : vector<1x128xf32>
    %157 = vector.broadcast %18 : f32 to vector<1x128xf32>
    %158 = arith.mulf %91, %157 : vector<1x128xf32>
    %159 = arith.addf %156, %158 : vector<1x128xf32>
    %160 = vector.broadcast %19 : f32 to vector<1x128xf32>
    %161 = arith.mulf %93, %160 : vector<1x128xf32>
    %162 = arith.addf %159, %161 : vector<1x128xf32>
    %163 = vector.broadcast %20 : f32 to vector<1x128xf32>
    %164 = arith.mulf %95, %163 : vector<1x128xf32>
    %165 = arith.addf %162, %164 : vector<1x128xf32>
    %cst_165 = arith.constant 0.000000e+00 : f32
    %166 = vector.broadcast %cst_165 : f32 to vector<1x128xf32>
    %167 = arith.maximumf %165, %166 : vector<1x128xf32>
    %168 = vector.broadcast %21 : f32 to vector<1x128xf32>
    %169 = arith.mulf %83, %168 : vector<1x128xf32>
    %170 = vector.broadcast %38 : f32 to vector<1x128xf32>
    %171 = arith.addf %169, %170 : vector<1x128xf32>
    %172 = vector.broadcast %22 : f32 to vector<1x128xf32>
    %173 = arith.mulf %85, %172 : vector<1x128xf32>
    %174 = arith.addf %171, %173 : vector<1x128xf32>
    %175 = vector.broadcast %23 : f32 to vector<1x128xf32>
    %176 = arith.mulf %87, %175 : vector<1x128xf32>
    %177 = arith.addf %174, %176 : vector<1x128xf32>
    %178 = vector.broadcast %24 : f32 to vector<1x128xf32>
    %179 = arith.mulf %89, %178 : vector<1x128xf32>
    %180 = arith.addf %177, %179 : vector<1x128xf32>
    %181 = vector.broadcast %25 : f32 to vector<1x128xf32>
    %182 = arith.mulf %91, %181 : vector<1x128xf32>
    %183 = arith.addf %180, %182 : vector<1x128xf32>
    %184 = vector.broadcast %26 : f32 to vector<1x128xf32>
    %185 = arith.mulf %93, %184 : vector<1x128xf32>
    %186 = arith.addf %183, %185 : vector<1x128xf32>
    %187 = vector.broadcast %27 : f32 to vector<1x128xf32>
    %188 = arith.mulf %95, %187 : vector<1x128xf32>
    %189 = arith.addf %186, %188 : vector<1x128xf32>
    %cst_166 = arith.constant 0.000000e+00 : f32
    %190 = vector.broadcast %cst_166 : f32 to vector<1x128xf32>
    %191 = arith.maximumf %189, %190 : vector<1x128xf32>
    %192 = vector.broadcast %28 : f32 to vector<1x128xf32>
    %193 = arith.mulf %83, %192 : vector<1x128xf32>
    %194 = vector.broadcast %39 : f32 to vector<1x128xf32>
    %195 = arith.addf %193, %194 : vector<1x128xf32>
    %196 = vector.broadcast %29 : f32 to vector<1x128xf32>
    %197 = arith.mulf %85, %196 : vector<1x128xf32>
    %198 = arith.addf %195, %197 : vector<1x128xf32>
    %199 = vector.broadcast %30 : f32 to vector<1x128xf32>
    %200 = arith.mulf %87, %199 : vector<1x128xf32>
    %201 = arith.addf %198, %200 : vector<1x128xf32>
    %202 = vector.broadcast %31 : f32 to vector<1x128xf32>
    %203 = arith.mulf %89, %202 : vector<1x128xf32>
    %204 = arith.addf %201, %203 : vector<1x128xf32>
    %205 = vector.broadcast %32 : f32 to vector<1x128xf32>
    %206 = arith.mulf %91, %205 : vector<1x128xf32>
    %207 = arith.addf %204, %206 : vector<1x128xf32>
    %208 = vector.broadcast %33 : f32 to vector<1x128xf32>
    %209 = arith.mulf %93, %208 : vector<1x128xf32>
    %210 = arith.addf %207, %209 : vector<1x128xf32>
    %211 = vector.broadcast %34 : f32 to vector<1x128xf32>
    %212 = arith.mulf %95, %211 : vector<1x128xf32>
    %213 = arith.addf %210, %212 : vector<1x128xf32>
    %cst_167 = arith.constant 0.000000e+00 : f32
    %214 = vector.broadcast %cst_167 : f32 to vector<1x128xf32>
    %215 = arith.maximumf %213, %214 : vector<1x128xf32>
    %216 = vector.broadcast %40 : f32 to vector<1x128xf32>
    %217 = arith.mulf %119, %216 : vector<1x128xf32>
    %218 = vector.broadcast %55 : f32 to vector<1x128xf32>
    %219 = arith.addf %217, %218 : vector<1x128xf32>
    %220 = vector.broadcast %41 : f32 to vector<1x128xf32>
    %221 = arith.mulf %143, %220 : vector<1x128xf32>
    %222 = arith.addf %219, %221 : vector<1x128xf32>
    %223 = vector.broadcast %42 : f32 to vector<1x128xf32>
    %224 = arith.mulf %167, %223 : vector<1x128xf32>
    %225 = arith.addf %222, %224 : vector<1x128xf32>
    %226 = vector.broadcast %43 : f32 to vector<1x128xf32>
    %227 = arith.mulf %191, %226 : vector<1x128xf32>
    %228 = arith.addf %225, %227 : vector<1x128xf32>
    %229 = vector.broadcast %44 : f32 to vector<1x128xf32>
    %230 = arith.mulf %215, %229 : vector<1x128xf32>
    %231 = arith.addf %228, %230 : vector<1x128xf32>
    %cst_168 = arith.constant 0.000000e+00 : f32
    %232 = vector.broadcast %cst_168 : f32 to vector<1x128xf32>
    %233 = arith.maximumf %231, %232 : vector<1x128xf32>
    %234 = vector.broadcast %45 : f32 to vector<1x128xf32>
    %235 = arith.mulf %119, %234 : vector<1x128xf32>
    %236 = vector.broadcast %56 : f32 to vector<1x128xf32>
    %237 = arith.addf %235, %236 : vector<1x128xf32>
    %238 = vector.broadcast %46 : f32 to vector<1x128xf32>
    %239 = arith.mulf %143, %238 : vector<1x128xf32>
    %240 = arith.addf %237, %239 : vector<1x128xf32>
    %241 = vector.broadcast %47 : f32 to vector<1x128xf32>
    %242 = arith.mulf %167, %241 : vector<1x128xf32>
    %243 = arith.addf %240, %242 : vector<1x128xf32>
    %244 = vector.broadcast %48 : f32 to vector<1x128xf32>
    %245 = arith.mulf %191, %244 : vector<1x128xf32>
    %246 = arith.addf %243, %245 : vector<1x128xf32>
    %247 = vector.broadcast %49 : f32 to vector<1x128xf32>
    %248 = arith.mulf %215, %247 : vector<1x128xf32>
    %249 = arith.addf %246, %248 : vector<1x128xf32>
    %cst_169 = arith.constant 0.000000e+00 : f32
    %250 = vector.broadcast %cst_169 : f32 to vector<1x128xf32>
    %251 = arith.maximumf %249, %250 : vector<1x128xf32>
    %252 = vector.broadcast %50 : f32 to vector<1x128xf32>
    %253 = arith.mulf %119, %252 : vector<1x128xf32>
    %254 = vector.broadcast %57 : f32 to vector<1x128xf32>
    %255 = arith.addf %253, %254 : vector<1x128xf32>
    %256 = vector.broadcast %51 : f32 to vector<1x128xf32>
    %257 = arith.mulf %143, %256 : vector<1x128xf32>
    %258 = arith.addf %255, %257 : vector<1x128xf32>
    %259 = vector.broadcast %52 : f32 to vector<1x128xf32>
    %260 = arith.mulf %167, %259 : vector<1x128xf32>
    %261 = arith.addf %258, %260 : vector<1x128xf32>
    %262 = vector.broadcast %53 : f32 to vector<1x128xf32>
    %263 = arith.mulf %191, %262 : vector<1x128xf32>
    %264 = arith.addf %261, %263 : vector<1x128xf32>
    %265 = vector.broadcast %54 : f32 to vector<1x128xf32>
    %266 = arith.mulf %215, %265 : vector<1x128xf32>
    %267 = arith.addf %264, %266 : vector<1x128xf32>
    %cst_170 = arith.constant 0.000000e+00 : f32
    %268 = vector.broadcast %cst_170 : f32 to vector<1x128xf32>
    %269 = arith.maximumf %267, %268 : vector<1x128xf32>
    %270 = vector.broadcast %58 : f32 to vector<1x128xf32>
    %271 = arith.mulf %233, %270 : vector<1x128xf32>
    %272 = vector.broadcast %76 : f32 to vector<1x128xf32>
    %273 = arith.addf %271, %272 : vector<1x128xf32>
    %274 = vector.broadcast %59 : f32 to vector<1x128xf32>
    %275 = arith.mulf %251, %274 : vector<1x128xf32>
    %276 = arith.addf %273, %275 : vector<1x128xf32>
    %277 = vector.broadcast %60 : f32 to vector<1x128xf32>
    %278 = arith.mulf %269, %277 : vector<1x128xf32>
    %279 = arith.addf %276, %278 : vector<1x128xf32>
    %280 = math.tanh %279 : vector<1x128xf32>
    %cst_171 = arith.constant 5.000000e-01 : f32
    %281 = vector.broadcast %cst_171 : f32 to vector<1x128xf32>
    %282 = arith.mulf %281, %280 : vector<1x128xf32>
    %cst_172 = arith.constant 5.000000e-01 : f32
    %283 = vector.broadcast %cst_172 : f32 to vector<1x128xf32>
    %284 = arith.addf %282, %283 : vector<1x128xf32>
    %c0_173 = arith.constant 0 : index
    %c0_174 = arith.constant 0 : index
    %c0_175 = arith.constant 0 : index
    %285 = vector.load %arg8[%c0_173, %c0_174, %c0_175] : memref<6x1x128xf32, #tpu.memory_space<vmem>>, vector<1x1x128xf32>
    %286 = vector.shape_cast %285 : vector<1x1x128xf32> to vector<1x128xf32>
    %287 = vector.shape_cast %284 : vector<1x128xf32> to vector<1x1x128xf32>
    tpu.vector_store %arg8[%c0_173, %c0_174, %c0_175], %287 {strides = array<i32>} : memref<6x1x128xf32, #tpu.memory_space<vmem>>, vector<1x1x128xf32>,
    %288 = vector.broadcast %61 : f32 to vector<1x128xf32>
    %289 = arith.mulf %233, %288 : vector<1x128xf32>
    %290 = vector.broadcast %77 : f32 to vector<1x128xf32>
    %291 = arith.addf %289, %290 : vector<1x128xf32>
    %292 = vector.broadcast %62 : f32 to vector<1x128xf32>
    %293 = arith.mulf %251, %292 : vector<1x128xf32>
    %294 = arith.addf %291, %293 : vector<1x128xf32>
    %295 = vector.broadcast %63 : f32 to vector<1x128xf32>
    %296 = arith.mulf %269, %295 : vector<1x128xf32>
    %297 = arith.addf %294, %296 : vector<1x128xf32>
    %298 = math.tanh %297 : vector<1x128xf32>
    %cst_176 = arith.constant 5.000000e-01 : f32
    %299 = vector.broadcast %cst_176 : f32 to vector<1x128xf32>
    %300 = arith.mulf %299, %298 : vector<1x128xf32>
    %cst_177 = arith.constant 5.000000e-01 : f32
    %301 = vector.broadcast %cst_177 : f32 to vector<1x128xf32>
    %302 = arith.addf %300, %301 : vector<1x128xf32>
    %c1_178 = arith.constant 1 : index
    %c0_179 = arith.constant 0 : index
    %c0_180 = arith.constant 0 : index
    %303 = vector.load %arg8[%c1_178, %c0_179, %c0_180] : memref<6x1x128xf32, #tpu.memory_space<vmem>>, vector<1x1x128xf32>
    %304 = vector.shape_cast %303 : vector<1x1x128xf32> to vector<1x128xf32>
    %305 = vector.shape_cast %302 : vector<1x128xf32> to vector<1x1x128xf32>
    tpu.vector_store %arg8[%c1_178, %c0_179, %c0_180], %305 {strides = array<i32>} : memref<6x1x128xf32, #tpu.memory_space<vmem>>, vector<1x1x128xf32>,
    %306 = vector.broadcast %64 : f32 to vector<1x128xf32>
    %307 = arith.mulf %233, %306 : vector<1x128xf32>
    %308 = vector.broadcast %78 : f32 to vector<1x128xf32>
    %309 = arith.addf %307, %308 : vector<1x128xf32>
    %310 = vector.broadcast %65 : f32 to vector<1x128xf32>
    %311 = arith.mulf %251, %310 : vector<1x128xf32>
    %312 = arith.addf %309, %311 : vector<1x128xf32>
    %313 = vector.broadcast %66 : f32 to vector<1x128xf32>
    %314 = arith.mulf %269, %313 : vector<1x128xf32>
    %315 = arith.addf %312, %314 : vector<1x128xf32>
    %316 = math.tanh %315 : vector<1x128xf32>
    %cst_181 = arith.constant 5.000000e-01 : f32
    %317 = vector.broadcast %cst_181 : f32 to vector<1x128xf32>
    %318 = arith.mulf %317, %316 : vector<1x128xf32>
    %cst_182 = arith.constant 5.000000e-01 : f32
    %319 = vector.broadcast %cst_182 : f32 to vector<1x128xf32>
    %320 = arith.addf %318, %319 : vector<1x128xf32>
    %c2_183 = arith.constant 2 : index
    %c0_184 = arith.constant 0 : index
    %c0_185 = arith.constant 0 : index
    %321 = vector.load %arg8[%c2_183, %c0_184, %c0_185] : memref<6x1x128xf32, #tpu.memory_space<vmem>>, vector<1x1x128xf32>
    %322 = vector.shape_cast %321 : vector<1x1x128xf32> to vector<1x128xf32>
    %323 = vector.shape_cast %320 : vector<1x128xf32> to vector<1x1x128xf32>
    tpu.vector_store %arg8[%c2_183, %c0_184, %c0_185], %323 {strides = array<i32>} : memref<6x1x128xf32, #tpu.memory_space<vmem>>, vector<1x1x128xf32>,
    %324 = vector.broadcast %67 : f32 to vector<1x128xf32>
    %325 = arith.mulf %233, %324 : vector<1x128xf32>
    %326 = vector.broadcast %79 : f32 to vector<1x128xf32>
    %327 = arith.addf %325, %326 : vector<1x128xf32>
    %328 = vector.broadcast %68 : f32 to vector<1x128xf32>
    %329 = arith.mulf %251, %328 : vector<1x128xf32>
    %330 = arith.addf %327, %329 : vector<1x128xf32>
    %331 = vector.broadcast %69 : f32 to vector<1x128xf32>
    %332 = arith.mulf %269, %331 : vector<1x128xf32>
    %333 = arith.addf %330, %332 : vector<1x128xf32>
    %334 = math.tanh %333 : vector<1x128xf32>
    %cst_186 = arith.constant 5.000000e-01 : f32
    %335 = vector.broadcast %cst_186 : f32 to vector<1x128xf32>
    %336 = arith.mulf %335, %334 : vector<1x128xf32>
    %cst_187 = arith.constant 5.000000e-01 : f32
    %337 = vector.broadcast %cst_187 : f32 to vector<1x128xf32>
    %338 = arith.addf %336, %337 : vector<1x128xf32>
    %c3_188 = arith.constant 3 : index
    %c0_189 = arith.constant 0 : index
    %c0_190 = arith.constant 0 : index
    %339 = vector.load %arg8[%c3_188, %c0_189, %c0_190] : memref<6x1x128xf32, #tpu.memory_space<vmem>>, vector<1x1x128xf32>
    %340 = vector.shape_cast %339 : vector<1x1x128xf32> to vector<1x128xf32>
    %341 = vector.shape_cast %338 : vector<1x128xf32> to vector<1x1x128xf32>
    tpu.vector_store %arg8[%c3_188, %c0_189, %c0_190], %341 {strides = array<i32>} : memref<6x1x128xf32, #tpu.memory_space<vmem>>, vector<1x1x128xf32>,
    %342 = vector.broadcast %70 : f32 to vector<1x128xf32>
    %343 = arith.mulf %233, %342 : vector<1x128xf32>
    %344 = vector.broadcast %80 : f32 to vector<1x128xf32>
    %345 = arith.addf %343, %344 : vector<1x128xf32>
    %346 = vector.broadcast %71 : f32 to vector<1x128xf32>
    %347 = arith.mulf %251, %346 : vector<1x128xf32>
    %348 = arith.addf %345, %347 : vector<1x128xf32>
    %349 = vector.broadcast %72 : f32 to vector<1x128xf32>
    %350 = arith.mulf %269, %349 : vector<1x128xf32>
    %351 = arith.addf %348, %350 : vector<1x128xf32>
    %352 = math.tanh %351 : vector<1x128xf32>
    %cst_191 = arith.constant 5.000000e-01 : f32
    %353 = vector.broadcast %cst_191 : f32 to vector<1x128xf32>
    %354 = arith.mulf %353, %352 : vector<1x128xf32>
    %cst_192 = arith.constant 5.000000e-01 : f32
    %355 = vector.broadcast %cst_192 : f32 to vector<1x128xf32>
    %356 = arith.addf %354, %355 : vector<1x128xf32>
    %c4_193 = arith.constant 4 : index
    %c0_194 = arith.constant 0 : index
    %c0_195 = arith.constant 0 : index
    %357 = vector.load %arg8[%c4_193, %c0_194, %c0_195] : memref<6x1x128xf32, #tpu.memory_space<vmem>>, vector<1x1x128xf32>
    %358 = vector.shape_cast %357 : vector<1x1x128xf32> to vector<1x128xf32>
    %359 = vector.shape_cast %356 : vector<1x128xf32> to vector<1x1x128xf32>
    tpu.vector_store %arg8[%c4_193, %c0_194, %c0_195], %359 {strides = array<i32>} : memref<6x1x128xf32, #tpu.memory_space<vmem>>, vector<1x1x128xf32>,
    %360 = vector.broadcast %73 : f32 to vector<1x128xf32>
    %361 = arith.mulf %233, %360 : vector<1x128xf32>
    %362 = vector.broadcast %81 : f32 to vector<1x128xf32>
    %363 = arith.addf %361, %362 : vector<1x128xf32>
    %364 = vector.broadcast %74 : f32 to vector<1x128xf32>
    %365 = arith.mulf %251, %364 : vector<1x128xf32>
    %366 = arith.addf %363, %365 : vector<1x128xf32>
    %367 = vector.broadcast %75 : f32 to vector<1x128xf32>
    %368 = arith.mulf %269, %367 : vector<1x128xf32>
    %369 = arith.addf %366, %368 : vector<1x128xf32>
    %370 = math.tanh %369 : vector<1x128xf32>
    %cst_196 = arith.constant 5.000000e-01 : f32
    %371 = vector.broadcast %cst_196 : f32 to vector<1x128xf32>
    %372 = arith.mulf %371, %370 : vector<1x128xf32>
    %cst_197 = arith.constant 5.000000e-01 : f32
    %373 = vector.broadcast %cst_197 : f32 to vector<1x128xf32>
    %374 = arith.addf %372, %373 : vector<1x128xf32>
    %c5_198 = arith.constant 5 : index
    %c0_199 = arith.constant 0 : index
    %c0_200 = arith.constant 0 : index
    %375 = vector.load %arg8[%c5_198, %c0_199, %c0_200] : memref<6x1x128xf32, #tpu.memory_space<vmem>>, vector<1x1x128xf32>
    %376 = vector.shape_cast %375 : vector<1x1x128xf32> to vector<1x128xf32>
    %377 = vector.shape_cast %374 : vector<1x128xf32> to vector<1x1x128xf32>
    tpu.vector_store %arg8[%c5_198, %c0_199, %c0_200], %377 {strides = array<i32>} : memref<6x1x128xf32, #tpu.memory_space<vmem>>, vector<1x1x128xf32>,
    return
  }
  func.func @transform_0(%arg0: i32) -> (i32, i32, i32) {
    %c0_i32 = arith.constant 0 : i32
    %c0_i32_0 = arith.constant 0 : i32
    %c0_i32_1 = arith.constant 0 : i32
    return %c0_i32, %arg0, %c0_i32_0 : i32, i32, i32
  }
  func.func @transform_1(%arg0: i32) -> (i32, i32) {
    %c0_i32 = arith.constant 0 : i32
    %c0_i32_0 = arith.constant 0 : i32
    %c0_i32_1 = arith.constant 0 : i32
    return %c0_i32, %c0_i32_0 : i32, i32
  }
  func.func @transform_2(%arg0: i32) -> i32 {
    %c0_i32 = arith.constant 0 : i32
    %c0_i32_0 = arith.constant 0 : i32
    return %c0_i32 : i32
  }
  func.func @transform_3(%arg0: i32) -> (i32, i32) {
    %c0_i32 = arith.constant 0 : i32
    %c0_i32_0 = arith.constant 0 : i32
    %c0_i32_1 = arith.constant 0 : i32
    return %c0_i32, %c0_i32_0 : i32, i32
  }
  func.func @transform_4(%arg0: i32) -> i32 {
    %c0_i32 = arith.constant 0 : i32
    %c0_i32_0 = arith.constant 0 : i32
    return %c0_i32 : i32
  }
  func.func @transform_5(%arg0: i32) -> (i32, i32) {
    %c0_i32 = arith.constant 0 : i32
    %c0_i32_0 = arith.constant 0 : i32
    %c0_i32_1 = arith.constant 0 : i32
    return %c0_i32, %c0_i32_0 : i32, i32
  }
  func.func @transform_6(%arg0: i32) -> i32 {
    %c0_i32 = arith.constant 0 : i32
    %c0_i32_0 = arith.constant 0 : i32
    return %c0_i32 : i32
  }
  func.func @transform_7(%arg0: i32) -> (i32, i32, i32) {
    %c0_i32 = arith.constant 0 : i32
    %c0_i32_0 = arith.constant 0 : i32
    %c0_i32_1 = arith.constant 0 : i32
    return %c0_i32, %arg0, %c0_i32_0 : i32, i32, i32
  }
}

</mosaic_0001>

<bundles_post_ra>
// kernel: net_forward_feature_major.1
= control target key start
LH: loop header
LB: loop body
LE: loop exit
PB: predicated region body
PF: predicated region fallthrough
CT: control target
= control target key end

     0   :  { %12 = vsyncpa [#allocation3], 0  ;;  %s1121_s0 = inlined_call_operand.vmem [shape: f32[7,1,128], index: 0, kind: input, shape index: {}]   ;;  %s1122_s1 = inlined_call_operand.vmem [shape: f32[5,7], index: 1, kind: input, shape index: {}]   ;;  %s1123_s2 = inlined_call_operand.vmem [shape: f32[5], index: 2, kind: input, shape index: {}]   ;;  %s1124_s3 = inlined_call_operand.vmem [shape: f32[3,5], index: 3, kind: input, shape index: {}]   ;;  %s1125_s4 = inlined_call_operand.vmem [shape: f32[3], index: 4, kind: input, shape index: {}]   ;;  %s1126_s5 = inlined_call_operand.vmem [shape: f32[6,3], index: 5, kind: input, shape index: {}]   ;;  %s1127_s6 = inlined_call_operand.vmem [shape: f32[6], index: 6, kind: input, shape index: {}]   ;;  %s1128_s7 = inlined_call_operand.vmem [shape: f32[6,1,128], index: 7, kind: output, shape index: {}]  }
   0x1   :  { %13 = vsyncpa [#allocation5], 0 }
   0x2   :  { %14 = vsyncpa [#allocation8], 0  ;;  %s34_s26 = sshll.u32 %s1123_s2, 4  ;;  %s35_s26 = int_to_ptr.vmem [resolvable:$true] %s34_s26 }
   0x3   :  { %15 = vsyncpa [#allocation11], 0  ;;  %s54_s29 = sshll.u32 %s1125_s4, 4  ;;  %s560_s30 = scalar_lea.vmem %s35_s26, 16  ;;  %s55_s29 = int_to_ptr.vmem [resolvable:$true] %s54_s29 }
   0x4   :  { %p561_p0 = scmp.ne.s32.totalorder %s35_s26, %s560_s30  ;;  %p565_p1 = scmp.lt.s32.totalorder %s35_s26, %s35_s26 }
   0x5   :  { %p566_p2 = scmp.lt.s32.totalorder %s560_s30, %s560_s30 }
   0x7   :  { %p567_p3 = por %p566_p2, %p565_p1 }
   0x9   :  { %p568_p4 = pnand %p567_p3, %p561_p0 }
   0xb   :  { %571 = shalt.err (!%p568_p4)
}
   0xc   :  { %s640_s8 = smov [#allocation4]   ;;  %s572_s9 = scalar_lea.vmem %s55_s29, 16 }
   0xd   :  { %37 = dma.vmem_to_smem %s35_s26, 16, %s640_s8, [#allocation5]  }
   0xe   :  { %p573_p5 = scmp.ne.s32.totalorder %s55_s29, %s572_s9  ;;  %p577_p6 = scmp.lt.s32.totalorder %s55_s29, %s55_s29 }
   0xf   :  { %p578_p7 = scmp.lt.s32.totalorder %s572_s9, %s572_s9 }
  0x11   :  { %p579_p8 = por %p578_p7, %p577_p6 }
  0x13   :  { %p580_p9 = pnand %p579_p8, %p573_p5 }
  0x15   :  { %583 = shalt.err (!%p580_p9)
}
  0x16   :  { %s641_s2 = smov [#allocation7]   ;;  %s24_s11 = sshll.u32 %s1122_s1, 4  ;;  %s25_s11 = int_to_ptr.vmem [resolvable:$true] %s24_s11 }
  0x17   :  { %57 = dma.vmem_to_smem %s55_s29, 16, %s641_s2, [#allocation8]  }
  0x18   :  { %s44_s14 = sshll.u32 %s1124_s3, 4  ;;  %s584_s15 = scalar_lea.vmem %s25_s11, 128  ;;  %s45_s14 = int_to_ptr.vmem [resolvable:$true] %s44_s14 }
  0x19   :  { %p585_p10 = scmp.ne.s32.totalorder %s25_s11, %s584_s15  ;;  %p589_p11 = scmp.lt.s32.totalorder %s25_s11, %s25_s11 }
  0x1a   :  { %p590_p12 = scmp.lt.s32.totalorder %s584_s15, %s584_s15 }
  0x1c   :  { %p591_p13 = por %p590_p12, %p589_p11 }
  0x1e   :  { %p592_p0 = pnand %p591_p13, %p585_p10 }
  0x20   :  { %595 = shalt.err (!%p592_p0)
}
  0x21   :  { %s642_s16 = smov [#allocation2]   ;;  %s596_s17 = scalar_lea.vmem %s45_s14, 64 }
  0x22   :  { %27 = dma.vmem_to_smem %s25_s11, 128, %s642_s16, [#allocation3]  }
  0x23   :  { %p597_p1 = scmp.ne.s32.totalorder %s45_s14, %s596_s17  ;;  %p601_p2 = scmp.lt.s32.totalorder %s45_s14, %s45_s14 }
  0x24   :  { %p602_p3 = scmp.lt.s32.totalorder %s596_s17, %s596_s17 }
  0x26   :  { %p603_p4 = por %p602_p3, %p601_p2 }
  0x28   :  { %p604_p5 = pnand %p603_p4, %p597_p1 }
  0x2a   :  { %607 = shalt.err (!%p604_p5)
}
  0x2b   :  { %s643_s1 = smov [#allocation6]   ;;  %s64_s19 = sshll.u32 %s1126_s5, 4  ;;  %s65_s19 = int_to_ptr.vmem [resolvable:$true] %s64_s19 }
  0x2c   :  { %47 = dma.vmem_to_smem %s45_s14, 64, %s643_s1, [#allocation5]  }
  0x2d   :  { %s74_s22 = sshll.u32 %s1127_s6, 4  ;;  %s608_s23 = scalar_lea.vmem %s65_s19, 128  ;;  %s75_s22 = int_to_ptr.vmem [resolvable:$true] %s74_s22 }
  0x2e   :  { %p609_p6 = scmp.ne.s32.totalorder %s65_s19, %s608_s23  ;;  %p613_p7 = scmp.lt.s32.totalorder %s65_s19, %s65_s19 }
  0x2f   :  { %p614_p8 = scmp.lt.s32.totalorder %s608_s23, %s608_s23 }
  0x31   :  { %p615_p9 = por %p614_p8, %p613_p7 }
  0x33   :  { %p616_p10 = pnand %p615_p9, %p609_p6 }
  0x35   :  { %619 = shalt.err (!%p616_p10)
}
  0x36   :  { %s644_s24 = smov [#allocation9]   ;;  %s620_s25 = scalar_lea.vmem %s75_s22, 16 }
  0x37   :  { %67 = dma.vmem_to_smem %s65_s19, 128, %s644_s24, [#allocation8]  }
  0x38   :  { %p621_p11 = scmp.ne.s32.totalorder %s75_s22, %s620_s25  ;;  %p625_p12 = scmp.lt.s32.totalorder %s75_s22, %s75_s22 }
  0x39   :  { %p626_p13 = scmp.lt.s32.totalorder %s620_s25, %s620_s25 }
  0x3b   :  { %p627_p0 = por %p626_p13, %p625_p12 }
  0x3d   :  { %p628_p1 = pnand %p627_p0, %p621_p11 }
  0x3f   :  { %631 = shalt.err (!%p628_p1)
}
  0x40   :  { %s645_s5 = smov [#allocation10]  }
  0x41   :  { %77 = dma.vmem_to_smem %s75_s22, 16, %s645_s5, [#allocation11]  }
  0x42   :  { %632 = dma.done.wait [#allocation3], 128  }
  0x43   :  { %633 = vsyncadd [#allocation3], 4294967168 }
  0x44   :  { %634 = dma.done.wait [#allocation5], 80  }
  0x45   :  { %635 = vsyncadd [#allocation5], 4294967216 }
  0x46   :  { %636 = dma.done.wait [#allocation8], 144  }
  0x47   :  { %637 = vsyncadd [#allocation8], 4294967152 }
  0x48   :  { %638 = dma.done.wait [#allocation11], 16  }
  0x49   :  { %639 = vsyncadd [#allocation11], 4294967280 }
  0x4a   :  { %96 = sfence }
  0x4b   :  { %s97_s6 = sld [smem:[#allocation2]]  ;;  %s455_s26 = sld [smem:[#allocation2 + $0x1]]  ;;  %v713_v0 = vld [vmem:[%s1121_s0] sm:$0x1]  ;;  %v722_v1 = vld [vmem:[%s1121_s0 + $0x1] sm:$0x1] }
  0x4c   :  { %s456_s27 = sld [smem:[#allocation2 + $0x2]]  ;;  %s704_s28 = sld [smem:[#allocation2 + $0x3]]  ;;  %v727_v2 = vld [vmem:[%s1121_s0 + $0x2] sm:$0x1]  ;;  %v736_v3 = vld [vmem:[%s1121_s0 + $0x3] sm:$0x1] }
  0x4d   :  { %s706_s29 = sld [smem:[#allocation2 + $0x4]]  ;;  %s708_s30 = sld [smem:[#allocation2 + $0x5]]  ;;  %v745_v4 = vld [vmem:[%s1121_s0 + $0x4] sm:$0x1]  ;;  %v754_v5 = vld [vmem:[%s1121_s0 + $0x5] sm:$0x1] }
  0x4e   :  { %s715_s2 = sld [smem:[#allocation2 + $0x6]]  ;;  %s717_s4 = sld [smem:[#allocation2 + $0x80]]  ;;  %v763_v8 = vld [vmem:[%s1121_s0 + $0x6] sm:$0x1] }
  0x4f   :  { %s729_s14 = sld [smem:[#allocation2 + $0x81]]  ;;  %s731_s15 = sld [smem:[#allocation2 + $0x82]] }
  0x50   :  { %s738_s1 = sld [smem:[#allocation2 + $0x83]]  ;;  %s740_s3 = sld [smem:[#allocation2 + $0x84]] }
  0x51   :  { %s747_s20 = sld [smem:[#allocation2 + $0x85]]  ;;  %s749_s21 = sld [smem:[#allocation2 + $0x86]]  ;;  %v192_v6 = vstv %s97_s6  ;;  %v196_v7 = vstv %s455_s26 }
  0x52   :  { %s756_s24 = sld [smem:[#allocation2 + $0x100]]  ;;  %s758_s25 = sld [smem:[#allocation2 + $0x101]]  ;;  %v766_v9 = vmul.f32 %v192_v6, %v713_v0  ;;  %v199_v10 = vstv %s456_s27  ;;  %v202_v11 = vstv %s704_s28  ;;  %v774_v12 = vmul.f32 %v722_v1, %v196_v7 }
  0x53   :  { %s769_s9 = sld [smem:[#allocation2 + $0x102]]  ;;  %s771_s6 = sld [smem:[#allocation2 + $0x103]]  ;;  %v777_v13 = vmul.f32 %v727_v2, %v199_v10  ;;  %v205_v14 = vstv %s706_s29  ;;  %v208_v15 = vstv %s708_s30  ;;  %v786_v16 = vmul.f32 %v736_v3, %v202_v11 }
  0x54   :  { %s781_s0 = sld [smem:[#allocation2 + $0x104]]  ;;  %s783_s26 = sld [smem:[#allocation2 + $0x105]]  ;;  %v789_v17 = vmul.f32 %v745_v4, %v205_v14  ;;  %v211_v18 = vstv %s715_s2  ;;  %v215_v19 = vstv %s717_s4  ;;  %v798_v20 = vmul.f32 %v754_v5, %v208_v15 }
  0x55   :  { %s793_s27 = sld [smem:[#allocation2 + $0x106]]  ;;  %s795_s28 = sld [smem:[#allocation2 + $0x180]]  ;;  %v801_v21 = vmul.f32 %v763_v8, %v211_v18  ;;  %v219_v22 = vstv %s729_s14  ;;  %v222_v23 = vstv %s731_s15  ;;  %v810_v24 = vmul.f32 %v215_v19, %v713_v0 }
  0x56   :  { %s805_s29 = sld [smem:[#allocation2 + $0x181]]  ;;  %s807_s30 = sld [smem:[#allocation2 + $0x182]]  ;;  %v813_v25 = vmul.f32 %v722_v1, %v219_v22  ;;  %v225_v26 = vstv %s738_s1  ;;  %v228_v27 = vstv %s740_s3  ;;  %v822_v28 = vmul.f32 %v727_v2, %v222_v23 }
  0x57   :  { %s817_s2 = sld [smem:[#allocation2 + $0x183]]  ;;  %s819_s4 = sld [smem:[#allocation2 + $0x184]]  ;;  %v825_v29 = vmul.f32 %v736_v3, %v225_v26  ;;  %v231_v30 = vstv %s747_s20  ;;  %v234_v31 = vstv %s749_s21  ;;  %v834_v32 = vmul.f32 %v745_v4, %v228_v27 }
  0x58   :  { %s829_s10 = sld [smem:[#allocation2 + $0x185]]  ;;  %s831_s11 = sld [smem:[#allocation2 + $0x186]]  ;;  %v837_v33 = vmul.f32 %v754_v5, %v231_v30  ;;  %v238_v34 = vstv %s756_s24  ;;  %v242_v35 = vstv %s758_s25  ;;  %v846_v36 = vmul.f32 %v763_v8, %v234_v31 }
  0x59   :  { %s841_s12 = sld [smem:[#allocation2 + $0x200]]  ;;  %s843_s13 = sld [smem:[#allocation2 + $0x201]]  ;;  %v849_v37 = vmul.f32 %v238_v34, %v713_v0  ;;  %v245_v38 = vstv %s769_s9  ;;  %v248_v39 = vstv %s771_s6  ;;  %v858_v40 = vmul.f32 %v722_v1, %v242_v35 }
  0x5a   :  { %s853_s14 = sld [smem:[#allocation2 + $0x202]]  ;;  %s855_s15 = sld [smem:[#allocation2 + $0x203]]  ;;  %v861_v41 = vmul.f32 %v727_v2, %v245_v38  ;;  %v251_v42 = vstv %s781_s0  ;;  %v254_v43 = vstv %s783_s26  ;;  %v870_v44 = vmul.f32 %v736_v3, %v248_v39 }
  0x5b   :  { %s865_s16 = sld [smem:[#allocation2 + $0x204]]  ;;  %s867_s17 = sld [smem:[#allocation2 + $0x205]]  ;;  %v873_v45 = vmul.f32 %v745_v4, %v251_v42  ;;  %v257_v46 = vstv %s793_s27  ;;  %v261_v47 = vstv %s795_s28  ;;  %v882_v48 = vmul.f32 %v754_v5, %v254_v43 }
  0x5c   :  { %s877_s1 = sld [smem:[#allocation2 + $0x206]]  ;;  %s879_s3 = sld [smem:[#allocation4]]  ;;  %v885_v49 = vmul.f32 %v763_v8, %v257_v46  ;;  %v265_v50 = vstv %s805_s29  ;;  %v268_v51 = vstv %s807_s30  ;;  %v262_v52 = vmul.f32 %v261_v47, %v713_v0 }
  0x5d   :  { %s889_s18 = sld [smem:[#allocation4 + $0x1]]  ;;  %s891_s19 = sld [smem:[#allocation4 + $0x2]]  ;;  %v266_v53 = vmul.f32 %v722_v1, %v265_v50  ;;  %v271_v54 = vstv %s817_s2  ;;  %v274_v55 = vstv %s819_s4  ;;  %v902_v56 = vmul.f32 %v727_v2, %v268_v51 }
  0x5e   :  { %s897_s20 = sld [smem:[#allocation4 + $0x3]]  ;;  %s899_s21 = sld [smem:[#allocation4 + $0x4]]  ;;  %v905_v57 = vmul.f32 %v736_v3, %v271_v54  ;;  %v277_v58 = vstv %s829_s10  ;;  %v280_v59 = vstv %s831_s11  ;;  %v914_v60 = vmul.f32 %v745_v4, %v274_v55 }
  0x5f   :  { %s909_s22 = sld [smem:[#allocation6]]  ;;  %s911_s23 = sld [smem:[#allocation6 + $0x1]]  ;;  %v917_v61 = vmul.f32 %v754_v5, %v277_v58  ;;  %v284_v62 = vstv %s841_s12  ;;  %v288_v63 = vstv %s843_s13  ;;  %v926_v6 = vmul.f32 %v763_v8, %v280_v59 }
  0x60   :  { %s921_s24 = sld [smem:[#allocation6 + $0x2]]  ;;  %s923_s25 = sld [smem:[#allocation6 + $0x3]]  ;;  %v285_v7 = vmul.f32 %v284_v62, %v713_v0  ;;  %v291_v10 = vstv %s853_s14  ;;  %v294_v11 = vstv %s855_s15  ;;  %v289_v14 = vmul.f32 %v722_v1, %v288_v63 }
  0x61   :  { %s931_s5 = sld [smem:[#allocation6 + $0x4]]  ;;  %s933_s8 = sld [smem:[#allocation6 + $0x80]]  ;;  %v292_v15 = vmul.f32 %v727_v2, %v291_v10  ;;  %v297_v18 = vstv %s865_s16  ;;  %v300_v19 = vstv %s867_s17  ;;  %v295_v22 = vmul.f32 %v736_v3, %v294_v11 }
  0x62   :  { %s939_s9 = sld [smem:[#allocation6 + $0x81]]  ;;  %s941_s6 = sld [smem:[#allocation6 + $0x82]]  ;;  %v194_v0 = vstv %s879_s3  ;;  %v298_v23 = vmul.f32 %v745_v4, %v297_v18  ;;  %v303_v26 = vstv %s877_s1  ;;  %v301_v30 = vmul.f32 %v754_v5, %v300_v19 }
  0x63   :  { %s947_s0 = sld [smem:[#allocation6 + $0x83]]  ;;  %v195_v1 = vadd.f32 %v194_v0, %v766_v9  ;;  %v217_v27 = vstv %s889_s18  ;;  %v240_v2 = vstv %s891_s19  ;;  %s953_s26 = sld [smem:[#allocation6 + $0x84]]  ;;  %v304_v39 = vmul.f32 %v763_v8, %v303_v26 }
  0x64   :  { %v218_v31 = vadd.f32 %v217_v27, %v810_v24  ;;  %v241_v34 = vadd.f32 %v240_v2, %v849_v37  ;;  %v263_v3 = vstv %s897_s20  ;;  %v286_v35 = vstv %s899_s21  ;;  %s959_s27 = sld [smem:[#allocation6 + $0x100]]  ;;  %s963_s28 = sld [smem:[#allocation6 + $0x101]] }
  0x65   :  { %v198_v4 = vadd.f32 %v774_v12, %v195_v1  ;;  %v264_v9 = vadd.f32 %v263_v3, %v262_v52  ;;  %v287_v38 = vadd.f32 %v286_v35, %v285_v7  ;;  %s965_s29 = sld [smem:[#allocation7]]  ;;  %v307_v37 = vstv %s909_s22  ;;  %s971_s30 = sld [smem:[#allocation7 + $0x1]] }
  0x66   :  { %v221_v5 = vadd.f32 %v813_v25, %v218_v31  ;;  %v244_v24 = vadd.f32 %v858_v40, %v241_v34  ;;  %v311_v42 = vstv %s911_s23  ;;  %s973_s2 = sld [smem:[#allocation7 + $0x2]]  ;;  %v314_v46 = vstv %s921_s24  ;;  %s979_s10 = sld [smem:[#allocation6 + $0x103]] }
  0x67   :  { %v201_v12 = vadd.f32 %v777_v13, %v198_v4  ;;  %v267_v8 = vadd.f32 %v266_v53, %v264_v9  ;;  %v290_v43 = vadd.f32 %v289_v14, %v287_v38  ;;  %s977_s4 = sld [smem:[#allocation6 + $0x102]]  ;;  %v317_v47 = vstv %s923_s25  ;;  %s985_s11 = sld [smem:[#allocation6 + $0x104]] }
  0x68   :  { %v224_v25 = vadd.f32 %v822_v28, %v221_v5  ;;  %v247_v40 = vadd.f32 %v861_v41, %v244_v24  ;;  %v320_v50 = vstv %s931_s5  ;;  %v324_v53 = vstv %s933_s8  ;;  %s990_s12 = sld [smem:[#allocation9]]  ;;  %s1001_s14 = sld [smem:[#allocation9 + $0x1]] }
  0x69   :  { %v204_v13 = vadd.f32 %v786_v16, %v201_v12  ;;  %v270_v51 = vadd.f32 %v902_v56, %v267_v8  ;;  %v293_v52 = vadd.f32 %v292_v15, %v290_v43  ;;  %s992_s13 = sld [smem:[#allocation10]]  ;;  %v328_v54 = vstv %s939_s9  ;;  %s1010_s15 = sld [smem:[#allocation9 + $0x2]] }
  0x6a   :  { %v227_v28 = vadd.f32 %v825_v29, %v224_v25  ;;  %v250_v41 = vadd.f32 %v870_v44, %v247_v40  ;;  %v331_v55 = vstv %s941_s6  ;;  %v334_v59 = vstv %s947_s0  ;;  %s1019_s16 = sld [smem:[#allocation9 + $0x80]]  ;;  %s1021_s17 = sld [smem:[#allocation9 + $0x81]] }
  0x6b   :  { %v207_v58 = vadd.f32 %v789_v17, %v204_v13  ;;  %v273_v16 = vadd.f32 %v905_v57, %v270_v51  ;;  %v296_v56 = vadd.f32 %v295_v22, %v293_v52  ;;  %v309_v63 = vstv %s965_s29  ;;  %s1027_s1 = sld [smem:[#allocation9 + $0x82]]  ;;  %s1029_s3 = sld [smem:[#allocation10 + $0x1]] }
  0x6c   :  { %v230_v62 = vadd.f32 %v834_v32, %v227_v28  ;;  %v253_v29 = vadd.f32 %v873_v45, %v250_v41  ;;  %v337_v7 = vstv %s953_s26  ;;  %v341_v57 = vstv %s959_s27  ;;  %s1033_s18 = sld [smem:[#allocation9 + $0x100]]  ;;  %s1035_s19 = sld [smem:[#allocation9 + $0x101]] }
  0x6d   :  { %v210_v44 = vadd.f32 %v798_v20, %v207_v58  ;;  %v276_v10 = vadd.f32 %v914_v60, %v273_v16  ;;  %v299_v17 = vadd.f32 %v298_v23, %v296_v56  ;;  %v326_v32 = vstv %s971_s30  ;;  %s1039_s20 = sld [smem:[#allocation9 + $0x102]]  ;;  %s1045_s8 = sld [smem:[#allocation9 + $0x180]] }
  0x6e   :  { %v233_v11 = vadd.f32 %v837_v33, %v230_v62  ;;  %v256_v14 = vadd.f32 %v882_v48, %v253_v29  ;;  %v343_v15 = vstv %s973_s2  ;;  %v345_v19 = vstv %s963_s28  ;;  %s1041_s21 = sld [smem:[#allocation10 + $0x2]]  ;;  %s1047_s9 = sld [smem:[#allocation9 + $0x181]] }
  0x6f   :  { %v213_v45 = vadd.f32 %v801_v21, %v210_v44  ;;  %v279_v18 = vadd.f32 %v917_v61, %v276_v10  ;;  %v302_v20 = vadd.f32 %v301_v30, %v299_v17  ;;  %v348_v48 = vstv %s977_s4  ;;  %s1054_s6 = sld [smem:[#allocation9 + $0x182]]  ;;  %s1056_s0 = sld [smem:[#allocation10 + $0x3]] }
  0x70   :  { %v236_v60 = vadd.f32 %v846_v36, %v233_v11  ;;  %v259_v33 = vadd.f32 %v885_v49, %v256_v14  ;;  %v351_v0 = vstv %s979_s10  ;;  %v354_v23 = vstv %s985_s11  ;;  %s1060_s22 = sld [smem:[#allocation9 + $0x200]]  ;;  %s1062_s26 = sld [smem:[#allocation9 + $0x201]] }
  0x71   :  { %v214_v21 = vmax.f32 %v213_v45, 0.0  ;;  %v282_v61 = vadd.f32 %v926_v6, %v279_v18  ;;  %v305_v22 = vadd.f32 %v304_v39, %v302_v20  ;;  %v358_v26 = vstv %s990_s12  ;;  %s1066_s23 = sld [smem:[#allocation9 + $0x202]]  ;;  %s1068_s24 = sld [smem:[#allocation10 + $0x4]] }
  0x72   :  { %v237_v36 = vmax.f32 %v236_v60, 0.0  ;;  %v260_v49 = vmax.f32 %v259_v33, 0.0  ;;  %v360_v1 = vstv %s992_s13  ;;  %v362_v35 = vstv %s1001_s14  ;;  %s1070_s25 = sld [smem:[#allocation9 + $0x280]]  ;;  %s1072_s5 = sld [smem:[#allocation9 + $0x281]] }
  0x73   :  { %v283_v27 = vmax.f32 %v282_v61, 0.0  ;;  %v306_v6 = vmax.f32 %v305_v22, 0.0  ;;  %v308_v2 = vmul.f32 %v307_v37, %v214_v21  ;;  %v325_v30 = vmul.f32 %v324_v53, %v214_v21  ;;  %s1075_s27 = sld [smem:[#allocation9 + $0x282]]  ;;  %s1077_s28 = sld [smem:[#allocation10 + $0x5]] }
  0x74   :  { %v312_v31 = vmul.f32 %v311_v42, %v237_v36  ;;  %v315_v34 = vmul.f32 %v314_v46, %v260_v49  ;;  %v329_v3 = vmul.f32 %v328_v54, %v237_v36  ;;  %v332_v39 = vmul.f32 %v331_v55, %v260_v49 }
  0x75   :  { %v310_v4 = vadd.f32 %v309_v63, %v308_v2  ;;  %v318_v9 = vmul.f32 %v317_v47, %v283_v27  ;;  %v327_v38 = vadd.f32 %v326_v32, %v325_v30  ;;  %v321_v5 = vmul.f32 %v320_v50, %v306_v6 }
  0x76   :  { %v335_v24 = vmul.f32 %v334_v59, %v283_v27  ;;  %v342_v37 = vmul.f32 %v341_v57, %v214_v21  ;;  %v346_v42 = vmul.f32 %v345_v19, %v237_v36  ;;  %v338_v43 = vmul.f32 %v337_v7, %v306_v6 }
  0x77   :  { %v313_v12 = vadd.f32 %v312_v31, %v310_v4  ;;  %v330_v8 = vadd.f32 %v329_v3, %v327_v38  ;;  %v349_v46 = vmul.f32 %v348_v48, %v260_v49  ;;  %v352_v40 = vmul.f32 %v351_v0, %v283_v27 }
  0x78   :  { %v344_v25 = vadd.f32 %v343_v15, %v342_v37  ;;  %v355_v47 = vmul.f32 %v354_v23, %v306_v6  ;;  %v365_v50 = vstv %s1010_s15  ;;  %v372_v52 = vstv %s1019_s16 }
  0x79   :  { %v316_v13 = vadd.f32 %v315_v34, %v313_v12  ;;  %v333_v51 = vadd.f32 %v332_v39, %v330_v8  ;;  %v374_v53 = vstv %s1029_s3  ;;  %v376_v41 = vstv %s1021_s17 }
  0x7a   :  { %v347_v28 = vadd.f32 %v346_v42, %v344_v25  ;;  %v379_v54 = vstv %s1027_s1  ;;  %v387_v55 = vstv %s1033_s18  ;;  %v389_v56 = vstv %s1041_s21 }
  0x7b   :  { %v319_v58 = vadd.f32 %v318_v9, %v316_v13  ;;  %v336_v16 = vadd.f32 %v335_v24, %v333_v51  ;;  %v391_v59 = vstv %s1035_s19  ;;  %v394_v29 = vstv %s1039_s20 }
  0x7c   :  { %v350_v62 = vadd.f32 %v349_v46, %v347_v28  ;;  %v402_v63 = vstv %s1045_s8  ;;  %v404_v7 = vstv %s1056_s0  ;;  %v406_v17 = vstv %s1047_s9 }
  0x7d   :  { %v322_v44 = vadd.f32 %v321_v5, %v319_v58  ;;  %v339_v10 = vadd.f32 %v338_v43, %v336_v16  ;;  %v409_v57 = vstv %s1054_s6  ;;  %v417_v14 = vstv %s1060_s22 }
  0x7e   :  { %v353_v11 = vadd.f32 %v352_v40, %v350_v62  ;;  %v419_v32 = vstv %s1068_s24  ;;  %v421_v15 = vstv %s1062_s26  ;;  %v424_v20 = vstv %s1066_s23 }
  0x7f   :  { %v323_v45 = vmax.f32 %v322_v44, 0.0  ;;  %v340_v18 = vmax.f32 %v339_v10, 0.0  ;;  %v432_v19 = vstv %s1070_s25  ;;  %v434_v33 = vstv %s1077_s28 }
  0x80   :  { %v356_v60 = vadd.f32 %v355_v47, %v353_v11  ;;  %v436_v48 = vstv %s1072_s5  ;;  %v439_v0 = vstv %s1075_s27 }
  0x81   :  { %v359_v21 = vmul.f32 %v358_v26, %v323_v45  ;;  %v363_v61 = vmul.f32 %v362_v35, %v340_v18  ;;  %v373_v22 = vmul.f32 %v372_v52, %v323_v45  ;;  %v377_v23 = vmul.f32 %v376_v41, %v340_v18 }
  0x82   :  { %v357_v36 = vmax.f32 %v356_v60, 0.0  ;;  %v388_v49 = vmul.f32 %v387_v55, %v323_v45  ;;  %v392_v27 = vmul.f32 %v391_v59, %v340_v18  ;;  %v403_v6 = vmul.f32 %v402_v63, %v323_v45 }
  0x83   :  { %v361_v2 = vadd.f32 %v360_v1, %v359_v21  ;;  %v375_v30 = vadd.f32 %v374_v53, %v373_v22  ;;  %v407_v31 = vmul.f32 %v406_v17, %v340_v18  ;;  %v418_v34 = vmul.f32 %v417_v14, %v323_v45 }
  0x84   :  { %v366_v3 = vmul.f32 %v365_v50, %v357_v36  ;;  %v380_v4 = vmul.f32 %v379_v54, %v357_v36  ;;  %v390_v9 = vadd.f32 %v389_v56, %v388_v49  ;;  %v395_v38 = vmul.f32 %v394_v29, %v357_v36 }
  0x85   :  { %v364_v39 = vadd.f32 %v363_v61, %v361_v2  ;;  %v378_v5 = vadd.f32 %v377_v23, %v375_v30  ;;  %v405_v24 = vadd.f32 %v404_v7, %v403_v6  ;;  %v410_v26 = vmul.f32 %v409_v57, %v357_v36 }
  0x86   :  { %v393_v35 = vadd.f32 %v392_v27, %v390_v9  ;;  %v420_v37 = vadd.f32 %v419_v32, %v418_v34  ;;  %v422_v42 = vmul.f32 %v421_v15, %v340_v18  ;;  %v425_v12 = vmul.f32 %v424_v20, %v357_v36 }
  0x87   :  { %v367_v8 = vadd.f32 %v366_v3, %v364_v39  ;;  %v381_v43 = vadd.f32 %v380_v4, %v378_v5  ;;  %v408_v46 = vadd.f32 %v407_v31, %v405_v24  ;;  %v433_v25 = vmul.f32 %v432_v19, %v323_v45 }
  0x88   :  { %v396_v1 = vadd.f32 %v395_v38, %v393_v35  ;;  %v423_v40 = vadd.f32 %v422_v42, %v420_v37  ;;  %v437_v47 = vmul.f32 %v436_v48, %v340_v18  ;;  %v440_v51 = vmul.f32 %v439_v0, %v357_v36 }
  0x89   :  { %548 = vtanh.f32 %v367_v8  ;;  %v411_v50 = vadd.f32 %v410_v26, %v408_v46  ;;  %v435_v13 = vadd.f32 %v434_v33, %v433_v25 }
  0x8a   :  { %550 = vtanh.f32 %v381_v43  ;;  %v426_v52 = vadd.f32 %v425_v12, %v423_v40 }
  0x8b   :  { %552 = vtanh.f32 %v396_v1  ;;  %v438_v53 = vadd.f32 %v437_v47, %v435_v13 }
  0x8c   :  { %554 = vtanh.f32 %v411_v50 }
  0x8d   :  { %556 = vtanh.f32 %v426_v52  ;;  %v441_v28 = vadd.f32 %v440_v51, %v438_v53 }
  0x8f   :  { %558 = vtanh.f32 %v441_v28 }
  0x93   :  { %v549_v41 = vpop.eup %548 }
  0x94   :  { %v551_v54 = vpop.eup %550  ;;  %v369_v55 = vmul.f32 0.5, %v549_v41 }
  0x95   :  { %v553_v58 = vpop.eup %552  ;;  %v383_v16 = vmul.f32 0.5, %v551_v54 }
  0x96   :  { %v555_v56 = vpop.eup %554  ;;  %v370_v59 = vadd.f32 0.5, %v369_v55  ;;  %v398_v62 = vmul.f32 0.5, %v553_v58 }
  0x97   :  { %v557_v29 = vpop.eup %556  ;;  %v384_v63 = vadd.f32 0.5, %v383_v16  ;;  %v413_v7 = vmul.f32 0.5, %v555_v56 }
  0x98   :  { %371 = vst [vmem:[%s1128_s7] sm:$0x1] %v370_v59  ;;  %v399_v44 = vadd.f32 0.5, %v398_v62  ;;  %v428_v10 = vmul.f32 0.5, %v557_v29 }
  0x99   :  { %v559_v17 = vpop.eup %558  ;;  %537 = vst [vmem:[%s1128_s7 + $0x1] sm:$0x1] %v384_v63  ;;  %v414_v57 = vadd.f32 0.5, %v413_v7 }
  0x9a   :  { %538 = vst [vmem:[%s1128_s7 + $0x2] sm:$0x1] %v399_v44  ;;  %v429_v11 = vadd.f32 0.5, %v428_v10  ;;  %v443_v14 = vmul.f32 0.5, %v559_v17 }
  0x9b   :  { %539 = vst [vmem:[%s1128_s7 + $0x3] sm:$0x1] %v414_v57 }
  0x9c   :  { %540 = vst [vmem:[%s1128_s7 + $0x4] sm:$0x1] %v429_v11  ;;  %v444_v32 = vadd.f32 0.5, %v443_v14 }
  0x9e   :  { %541 = vst [vmem:[%s1128_s7 + $0x5] sm:$0x1] %v444_v32 }
  0x9f   :  { %451 = vsyncpa [#allocation3], 1 }
  0xa0   :  { %452 = vsyncpa [#allocation5], 1 }
  0xa1   :  { %453 = vsyncpa [#allocation8], 1 }
  0xa2   :  { %454 = vsyncpa [#allocation11], 1 }

</bundles_post_ra>
